<compile_context>
chip_gen: v7x
topology: tpu7x:2x2x1
jax: 0.10.0
libtpu: 0.0.40
codegen_flags: <defaults>
</compile_context>

<pallas_src>
import functools

import jax
import jax.numpy as jnp
from jax.experimental import pallas as pl
from jax.experimental.pallas import tpu as pltpu


def _round_up(x, m):
    return ((x + m - 1) // m) * m


def attention_kernel(e_ref, w_ref, b_ref, cw_ref, w1_ref, b1_ref, w2_ref, b2_ref,
                     out_ref, *, bin_label):
    bt, s, h = e_ref.shape                 # (Bt, S, H) batch tile
    cd = w_ref.dtype                       # MXU input dtype (f32 or bf16)

    e3 = e_ref[...]                        # (Bt, S, H)
    e2 = e3.reshape(bt * s, h)             # (Bt*S, H) -> fills MXU rows

    # u = tanh(E @ W + bias)   (MXU, f32 accumulation)
    u2 = jnp.tanh(
        jnp.dot(e2, w_ref[...], preferred_element_type=jnp.float32) + b_ref[...]
    )                                      # (Bt*S, H) f32
    u3 = u2.reshape(bt, s, h)              # (Bt, S, H)

    # score: VPU multiply + lane reduce (avoids a 1-lane MXU matmul)
    cw = cw_ref[...].reshape(1, 1, h)      # (1, 1, H)
    s3 = jnp.tanh(jnp.sum(u3 * cw, axis=-1, keepdims=True))   # (Bt, S, 1)

    # softmax over the sequence axis (sublane reduce per batch row)
    s_max = jnp.max(s3, axis=1, keepdims=True)                 # (Bt, 1, 1)
    p = jnp.exp(s3 - s_max)                                    # (Bt, S, 1)
    denom = jnp.sum(p, axis=1, keepdims=True)                  # (Bt, 1, 1)
    alpha = p * pl.reciprocal(denom, approx=True)              # (Bt, S, 1)

    # context vector: weighted sum of the raw embedding over S
    # TODO(synk): for large S*H move this to the MXU via a batched matmul.
    ctx = jnp.sum(alpha * e3.astype(jnp.float32), axis=1)      # (Bt, H) f32

    # classifier: Linear -> ReLU -> Linear -> (sigmoid | softmax)
    h1 = jnp.maximum(
        jnp.dot(ctx.astype(cd), w1_ref[...], preferred_element_type=jnp.float32)
        + b1_ref[...],
        0.0,
    )                                                          # (Bt, Hc)
    logits = (
        jnp.dot(h1.astype(cd), w2_ref[...], preferred_element_type=jnp.float32)
        + b2_ref[...]
    )                                                          # (Bt, DP); pad lanes = -1e9

    if bin_label:
        out = jax.nn.sigmoid(logits)
    else:
        lmax = jnp.max(logits, axis=-1, keepdims=True)
        el = jnp.exp(logits - lmax)        # padded lanes: exp(-1e9 - lmax) == 0
        out = el * pl.reciprocal(jnp.sum(el, axis=-1, keepdims=True), approx=True)

    out_ref[...] = out.astype(out_ref.dtype)                   # lane-dense (Bt, DP) store


def attention_forward(numerical, embedding, params, *, bin_label=False,
                      batch_tile=256, compute_dtype=jnp.float32):
    """Mirrors Attention.forward(numerical, embedding). `numerical` is unused
    by the reference forward. Set compute_dtype=jnp.bfloat16 on v6e/v7x for
    native-MXU inputs (relax numeric tolerances accordingly)."""
    del numerical
    B, S, H = embedding.shape
    f32 = jnp.float32

    # ---- batch tiling -------------------------------------------------------
    Bt = min(batch_tile, _round_up(B, 8))
    if B >= 16 and _round_up(B, Bt) // Bt < 2:
        # keep at least 2 grid steps so v7x's two TensorCores both get work
        Bt = _round_up(Bt // 2, 8)
    B_pad = _round_up(B, Bt)
    if B_pad != B:
        embedding = jnp.pad(embedding, ((0, B_pad - B), (0, 0), (0, 0)))
    grid = (B_pad // Bt,)

    # ---- parameter massaging (glue, not hot path) ---------------------------
    W = params["weight"].astype(compute_dtype)                    # (H, H)
    bias = params["bias"].reshape(1, H).astype(f32)               # (1, H)
    cw = params["context_weight"].reshape(1, H).astype(f32)       # (1, H) row
    w1t = params["cls_w1"].T.astype(compute_dtype)                # (H, Hc)  torch: x @ W.T
    b1 = params["cls_b1"].reshape(1, -1).astype(f32)              # (1, Hc)
    w2t = params["cls_w2"].T                                      # (Hc, D_out)
    Hc, D_out = w2t.shape
    DP = _round_up(D_out, 128)                                    # lane-dense output width
    w2t = jnp.pad(w2t, ((0, 0), (0, DP - D_out))).astype(compute_dtype)
    # Pad the bias lanes with a large negative so softmax over the padded lane
    # dim equals softmax over the real D_out lanes; padded lanes are sliced off.
    b2 = jnp.pad(params["cls_b2"].reshape(1, -1).astype(f32),
                 ((0, 0), (0, DP - D_out)), constant_values=-1e9)

    emb = embedding.astype(compute_dtype)

    out = pl.pallas_call(
        functools.partial(attention_kernel, bin_label=bin_label),
        out_shape=jax.ShapeDtypeStruct((B_pad, DP), f32),
        grid_spec=pltpu.PrefetchScalarGridSpec(
            num_scalar_prefetch=0,
            grid=grid,
            in_specs=[
                pl.BlockSpec((Bt, S, H), lambda i: (i, 0, 0)),    # embedding tile
                pl.BlockSpec((H, H), lambda i: (0, 0)),           # weight
                pl.BlockSpec((1, H), lambda i: (0, 0)),           # bias
                pl.BlockSpec((1, H), lambda i: (0, 0)),           # context weight (row)
                pl.BlockSpec((H, Hc), lambda i: (0, 0)),          # classifier W1^T
                pl.BlockSpec((1, Hc), lambda i: (0, 0)),          # classifier b1
                pl.BlockSpec((Hc, DP), lambda i: (0, 0)),         # classifier W2^T (padded)
                pl.BlockSpec((1, DP), lambda i: (0, 0)),          # classifier b2 (padded)
            ],
            out_specs=pl.BlockSpec((Bt, DP), lambda i: (i, 0)),
        ),
        compiler_params=pltpu.CompilerParams(
            dimension_semantics=("parallel",),
            # Tiles are tiny (<1 MiB double-buffered); 32 MiB is safe on
            # v5e/v6e (128 MiB VMEM) and v7x (64 MiB VMEM).
            vmem_limit_bytes=32 * 1024 * 1024,
        ),
    )(emb, W, bias, cw, w1t, b1, w2t, b2)
    return out[:B, :D_out]


def reference_forward(embedding, params, *, bin_label=False):
    """Pure-JAX reference matching the PyTorch forward semantics."""
    W, bias, cw = params["weight"], params["bias"], params["context_weight"]
    u = jnp.tanh(jnp.einsum("bsh,hk->bsk", embedding, W) + bias)
    s = jnp.tanh(jnp.einsum("bsk,kj->bsj", u, cw))[..., 0]        # (B, S)
    alpha = jax.nn.softmax(s, axis=1)
    ctx = jnp.einsum("bs,bsh->bh", alpha, embedding)
    h1 = jax.nn.relu(ctx @ params["cls_w1"].T + params["cls_b1"])
    logits = h1 @ params["cls_w2"].T + params["cls_b2"]
    return jax.nn.sigmoid(logits) if bin_label else jax.nn.softmax(logits, axis=1)


def make_params(key, D_in, H_cls, D_out, hidden_size):
    ks = jax.random.split(key, 7)
    std = 0.05
    k1 = 1.0 / jnp.sqrt(D_in)
    k2 = 1.0 / jnp.sqrt(H_cls)
    return {
        # nn.Parameter tensors, .normal_(0, 0.05) as in _create_weights
        "weight": std * jax.random.normal(ks[0], (hidden_size, hidden_size), jnp.float32),
        "bias": std * jax.random.normal(ks[1], (1, hidden_size), jnp.float32),
        "context_weight": std * jax.random.normal(ks[2], (hidden_size, 1), jnp.float32),
        # classifier Linear(D_in, H_cls) and Linear(H_cls, D_out), torch-style shapes
        "cls_w1": jax.random.uniform(ks[3], (H_cls, D_in), jnp.float32, -k1, k1),
        "cls_b1": jax.random.uniform(ks[4], (H_cls,), jnp.float32, -k1, k1),
        "cls_w2": jax.random.uniform(ks[5], (D_out, H_cls), jnp.float32, -k2, k2),
        "cls_b2": jax.random.uniform(ks[6], (D_out,), jnp.float32, -k2, k2),
    }


if __name__ == "__main__":
    # Shapes consistent with the module:
    #   hidden_size = D_in = 32, classifier hidden H = 16, D_out = 4
    B, S, hidden_size = 2, 8, 32
    D_in, H_cls, D_out = hidden_size, 16, 4

    key = jax.random.PRNGKey(0)
    k_emb, k_num, k_par, k_emb2 = jax.random.split(key, 4)
    params = make_params(k_par, D_in, H_cls, D_out, hidden_size)

    # Tolerance is relaxed slightly because the two softmax denominators use the
    # EUP approximate reciprocal (pl.reciprocal(..., approx=True)).
    TOL = 2e-3

    # Check 1: softmax head, tiny batch (single grid step, padded batch rows).
    embedding = jax.random.normal(k_emb, (B, S, hidden_size), jnp.float32)
    numerical = jax.random.normal(k_num, (B, 5), jnp.float32)  # unused by forward
    out = attention_forward(numerical, embedding, params, bin_label=False)
    out = jax.block_until_ready(out)
    ref = reference_forward(embedding, params, bin_label=False)
    assert out.shape == (B, D_out)
    assert jnp.allclose(out, ref, atol=TOL, rtol=TOL), (out, ref)

    # Check 2: sigmoid head, larger batch (exercises multi-step grid + padding).
    B2 = 40
    embedding2 = jax.random.normal(k_emb2, (B2, S, hidden_size), jnp.float32)
    numerical2 = jnp.zeros((B2, 5), jnp.float32)
    out2 = attention_forward(numerical2, embedding2, params, bin_label=True)
    out2 = jax.block_until_ready(out2)
    ref2 = reference_forward(embedding2, params, bin_label=True)
    assert out2.shape == (B2, D_out)
    assert jnp.allclose(out2, ref2, atol=TOL, rtol=TOL), (out2, ref2)

    print("KERNEL_OK")
</pallas_src>

<mosaic_0001>
module attributes {stable_mosaic.version = 11 : i64} {
  func.func @attention_kernel(%arg0: i32, %arg1: memref<8x8x32xf32, #tpu.memory_space<vmem>>, %arg2: memref<32x32xf32, #tpu.memory_space<vmem>>, %arg3: memref<1x32xf32, #tpu.memory_space<vmem>>, %arg4: memref<1x32xf32, #tpu.memory_space<vmem>>, %arg5: memref<32x16xf32, #tpu.memory_space<vmem>>, %arg6: memref<1x16xf32, #tpu.memory_space<vmem>>, %arg7: memref<16x128xf32, #tpu.memory_space<vmem>>, %arg8: memref<1x128xf32, #tpu.memory_space<vmem>>, %arg9: memref<8x128xf32, #tpu.memory_space<vmem>>) attributes {dimension_semantics = [#tpu.dimension_semantics<parallel>], iteration_bounds = array<i64: 1>, scalar_prefetch = 0 : i64, scratch_operands = 0 : i64, tpu.core_type = #tpu.core_type<tc>, window_params = [{transform_indices = @transform_0, window_bounds = array<i64: 8, 8, 32>}, {pipeline_mode = #tpu.pipeline_mode<synchronous>, transform_indices = @transform_1, window_bounds = array<i64: 32, 32>}, {pipeline_mode = #tpu.pipeline_mode<synchronous>, transform_indices = @transform_2, window_bounds = array<i64: 1, 32>}, {pipeline_mode = #tpu.pipeline_mode<synchronous>, transform_indices = @transform_3, window_bounds = array<i64: 1, 32>}, {pipeline_mode = #tpu.pipeline_mode<synchronous>, transform_indices = @transform_4, window_bounds = array<i64: 32, 16>}, {pipeline_mode = #tpu.pipeline_mode<synchronous>, transform_indices = @transform_5, window_bounds = array<i64: 1, 16>}, {pipeline_mode = #tpu.pipeline_mode<synchronous>, transform_indices = @transform_6, window_bounds = array<i64: 16, 128>}, {pipeline_mode = #tpu.pipeline_mode<synchronous>, transform_indices = @transform_7, window_bounds = array<i64: 1, 128>}, {transform_indices = @transform_8, window_bounds = array<i64: 8, 128>}]} {
    %c0 = arith.constant 0 : index
    %c0_0 = arith.constant 0 : index
    %c0_1 = arith.constant 0 : index
    %0 = vector.load %arg1[%c0, %c0_0, %c0_1] : memref<8x8x32xf32, #tpu.memory_space<vmem>>, vector<8x8x32xf32>
    %1 = vector.shape_cast %0 : vector<8x8x32xf32> to vector<64x32xf32>
    %c0_2 = arith.constant 0 : index
    %c0_3 = arith.constant 0 : index
    %2 = vector.load %arg2[%c0_2, %c0_3] : memref<32x32xf32, #tpu.memory_space<vmem>>, vector<32x32xf32>
    %cst = arith.constant dense<0.000000e+00> : vector<64x32xf32>
    %3 = tpu.matmul %1, %2, %cst {dimension_numbers = #tpu.dot_dimension_numbers<[1], [0], [0], [1], [0, 0, 1, 1], [], []>} : vector<64x32xf32>, vector<32x32xf32>, vector<64x32xf32> -> vector<64x32xf32>
    %c0_4 = arith.constant 0 : index
    %c0_5 = arith.constant 0 : index
    %4 = vector.load %arg3[%c0_4, %c0_5] : memref<1x32xf32, #tpu.memory_space<vmem>>, vector<1x32xf32>
    %5 = vector.broadcast %4 : vector<1x32xf32> to vector<64x32xf32>
    %6 = arith.addf %3, %5 : vector<64x32xf32>
    %7 = math.tanh %6 : vector<64x32xf32>
    %8 = vector.shape_cast %7 : vector<64x32xf32> to vector<8x8x32xf32>
    %c0_6 = arith.constant 0 : index
    %c0_7 = arith.constant 0 : index
    %9 = vector.load %arg4[%c0_6, %c0_7] : memref<1x32xf32, #tpu.memory_space<vmem>>, vector<1x32xf32>
    %10 = vector.shape_cast %9 : vector<1x32xf32> to vector<1x1x32xf32>
    %11 = vector.broadcast %10 : vector<1x1x32xf32> to vector<8x8x32xf32>
    %12 = arith.mulf %8, %11 : vector<8x8x32xf32>
    %cst_8 = arith.constant dense<0.000000e+00> : vector<8x8xf32>
    %13 = vector.multi_reduction <add>, %12, %cst_8 [2] : vector<8x8x32xf32> to vector<8x8xf32>
    %14 = vector.shape_cast %13 : vector<8x8xf32> to vector<8x8x1xf32>
    %15 = math.tanh %14 : vector<8x8x1xf32>
    %cst_9 = arith.constant dense<0xFF800000> : vector<8x1xf32>
    %16 = vector.multi_reduction <maximumf>, %15, %cst_9 [1] : vector<8x8x1xf32> to vector<8x1xf32>
    %17 = vector.shape_cast %16 : vector<8x1xf32> to vector<8x1x1xf32>
    %18 = vector.broadcast %17 : vector<8x1x1xf32> to vector<8x8x1xf32>
    %19 = arith.subf %15, %18 : vector<8x8x1xf32>
    %20 = math.exp %19 : vector<8x8x1xf32>
    %cst_10 = arith.constant dense<0.000000e+00> : vector<8x1xf32>
    %21 = vector.multi_reduction <add>, %20, %cst_10 [1] : vector<8x8x1xf32> to vector<8x1xf32>
    %22 = vector.shape_cast %21 : vector<8x1xf32> to vector<8x1x1xf32>
    %23 = tpu.reciprocal %22 {approx = true} : vector<8x1x1xf32> -> vector<8x1x1xf32>
    %24 = vector.broadcast %23 : vector<8x1x1xf32> to vector<8x8x1xf32>
    %25 = arith.mulf %20, %24 : vector<8x8x1xf32>
    %26 = vector.broadcast %25 : vector<8x8x1xf32> to vector<8x8x32xf32>
    %27 = arith.mulf %26, %0 : vector<8x8x32xf32>
    %cst_11 = arith.constant dense<0.000000e+00> : vector<8x32xf32>
    %28 = vector.multi_reduction <add>, %27, %cst_11 [1] : vector<8x8x32xf32> to vector<8x32xf32>
    %c0_12 = arith.constant 0 : index
    %c0_13 = arith.constant 0 : index
    %29 = vector.load %arg5[%c0_12, %c0_13] : memref<32x16xf32, #tpu.memory_space<vmem>>, vector<32x16xf32>
    %cst_14 = arith.constant dense<0.000000e+00> : vector<8x16xf32>
    %30 = tpu.matmul %28, %29, %cst_14 {dimension_numbers = #tpu.dot_dimension_numbers<[1], [0], [0], [1], [0, 0, 1, 1], [], []>} : vector<8x32xf32>, vector<32x16xf32>, vector<8x16xf32> -> vector<8x16xf32>
    %c0_15 = arith.constant 0 : index
    %c0_16 = arith.constant 0 : index
    %31 = vector.load %arg6[%c0_15, %c0_16] : memref<1x16xf32, #tpu.memory_space<vmem>>, vector<1x16xf32>
    %32 = vector.broadcast %31 : vector<1x16xf32> to vector<8x16xf32>
    %33 = arith.addf %30, %32 : vector<8x16xf32>
    %cst_17 = arith.constant 0.000000e+00 : f32
    %34 = vector.broadcast %cst_17 : f32 to vector<8x16xf32>
    %35 = arith.maximumf %33, %34 : vector<8x16xf32>
    %c0_18 = arith.constant 0 : index
    %c0_19 = arith.constant 0 : index
    %36 = vector.load %arg7[%c0_18, %c0_19] : memref<16x128xf32, #tpu.memory_space<vmem>>, vector<16x128xf32>
    %cst_20 = arith.constant dense<0.000000e+00> : vector<8x128xf32>
    %37 = tpu.matmul %35, %36, %cst_20 {dimension_numbers = #tpu.dot_dimension_numbers<[1], [0], [0], [1], [0, 0, 1, 1], [], []>} : vector<8x16xf32>, vector<16x128xf32>, vector<8x128xf32> -> vector<8x128xf32>
    %c0_21 = arith.constant 0 : index
    %c0_22 = arith.constant 0 : index
    %38 = vector.load %arg8[%c0_21, %c0_22] : memref<1x128xf32, #tpu.memory_space<vmem>>, vector<1x128xf32>
    %39 = vector.broadcast %38 : vector<1x128xf32> to vector<8x128xf32>
    %40 = arith.addf %37, %39 : vector<8x128xf32>
    %cst_23 = arith.constant dense<0xFF800000> : vector<8xf32>
    %41 = vector.multi_reduction <maximumf>, %40, %cst_23 [1] : vector<8x128xf32> to vector<8xf32>
    %42 = vector.shape_cast %41 : vector<8xf32> to vector<8x1xf32>
    %43 = vector.broadcast %42 : vector<8x1xf32> to vector<8x128xf32>
    %44 = arith.subf %40, %43 : vector<8x128xf32>
    %45 = math.exp %44 : vector<8x128xf32>
    %cst_24 = arith.constant dense<0.000000e+00> : vector<8xf32>
    %46 = vector.multi_reduction <add>, %45, %cst_24 [1] : vector<8x128xf32> to vector<8xf32>
    %47 = vector.shape_cast %46 : vector<8xf32> to vector<8x1xf32>
    %48 = tpu.reciprocal %47 {approx = true} : vector<8x1xf32> -> vector<8x1xf32>
    %49 = vector.broadcast %48 : vector<8x1xf32> to vector<8x128xf32>
    %50 = arith.mulf %45, %49 : vector<8x128xf32>
    %c0_25 = arith.constant 0 : index
    %c0_26 = arith.constant 0 : index
    %51 = vector.load %arg9[%c0_25, %c0_26] : memref<8x128xf32, #tpu.memory_space<vmem>>, vector<8x128xf32>
    tpu.vector_store %arg9[%c0_25, %c0_26], %50 {strides = array<i32>} : memref<8x128xf32, #tpu.memory_space<vmem>>, vector<8x128xf32>,
    return
  }
  func.func @transform_0(%arg0: i32) -> (i32, i32, i32) {
    %c0_i32 = arith.constant 0 : i32
    %c0_i32_0 = arith.constant 0 : i32
    %c0_i32_1 = arith.constant 0 : i32
    return %arg0, %c0_i32, %c0_i32_0 : i32, i32, i32
  }
  func.func @transform_1(%arg0: i32) -> (i32, i32) {
    %c0_i32 = arith.constant 0 : i32
    %c0_i32_0 = arith.constant 0 : i32
    %c0_i32_1 = arith.constant 0 : i32
    return %c0_i32, %c0_i32_0 : i32, i32
  }
  func.func @transform_2(%arg0: i32) -> (i32, i32) {
    %c0_i32 = arith.constant 0 : i32
    %c0_i32_0 = arith.constant 0 : i32
    %c0_i32_1 = arith.constant 0 : i32
    return %c0_i32, %c0_i32_0 : i32, i32
  }
  func.func @transform_3(%arg0: i32) -> (i32, i32) {
    %c0_i32 = arith.constant 0 : i32
    %c0_i32_0 = arith.constant 0 : i32
    %c0_i32_1 = arith.constant 0 : i32
    return %c0_i32, %c0_i32_0 : i32, i32
  }
  func.func @transform_4(%arg0: i32) -> (i32, i32) {
    %c0_i32 = arith.constant 0 : i32
    %c0_i32_0 = arith.constant 0 : i32
    %c0_i32_1 = arith.constant 0 : i32
    return %c0_i32, %c0_i32_0 : i32, i32
  }
  func.func @transform_5(%arg0: i32) -> (i32, i32) {
    %c0_i32 = arith.constant 0 : i32
    %c0_i32_0 = arith.constant 0 : i32
    %c0_i32_1 = arith.constant 0 : i32
    return %c0_i32, %c0_i32_0 : i32, i32
  }
  func.func @transform_6(%arg0: i32) -> (i32, i32) {
    %c0_i32 = arith.constant 0 : i32
    %c0_i32_0 = arith.constant 0 : i32
    %c0_i32_1 = arith.constant 0 : i32
    return %c0_i32, %c0_i32_0 : i32, i32
  }
  func.func @transform_7(%arg0: i32) -> (i32, i32) {
    %c0_i32 = arith.constant 0 : i32
    %c0_i32_0 = arith.constant 0 : i32
    %c0_i32_1 = arith.constant 0 : i32
    return %c0_i32, %c0_i32_0 : i32, i32
  }
  func.func @transform_8(%arg0: i32) -> (i32, i32) {
    %c0_i32 = arith.constant 0 : i32
    %c0_i32_0 = arith.constant 0 : i32
    return %arg0, %c0_i32 : i32, i32
  }
}

</mosaic_0001>

<bundles_post_ra>
// kernel: tpu_custom_call.1
= control target key start
LH: loop header
LB: loop body
LE: loop exit
PB: predicated region body
PF: predicated region fallthrough
CT: control target
= control target key end

     0   :  { %13 = vsyncpa [#allocation3], 0  ;;  %s1094_s0 = inlined_call_operand.hbm [shape: f32[8,8,32], index: 0, kind: input, shape index: {}]   ;;  %s1095_s1 = inlined_call_operand.vmem [shape: f32[32,32], index: 1, kind: input, shape index: {}]   ;;  %s1096_s2 = inlined_call_operand.vmem [shape: f32[1,32], index: 2, kind: input, shape index: {}]   ;;  %s1097_s3 = inlined_call_operand.vmem [shape: f32[1,32], index: 3, kind: input, shape index: {}]   ;;  %s1098_s4 = inlined_call_operand.vmem [shape: f32[32,16], index: 4, kind: input, shape index: {}]   ;;  %s1099_s5 = inlined_call_operand.vmem [shape: f32[1,16], index: 5, kind: input, shape index: {}]   ;;  %s1100_s6 = inlined_call_operand.vmem [shape: f32[16,128], index: 6, kind: input, shape index: {}]   ;;  %s1101_s7 = inlined_call_operand.vmem [shape: f32[1,128], index: 7, kind: input, shape index: {}]   ;;  %s1102_s8 = inlined_call_operand.hbm [shape: f32[8,128], index: 8, kind: output, shape index: {}]  }
   0x1   :  { %14 = vsyncpa [#allocation4], 0  ;;  %s874_s27 = smov [#allocation2]   ;;  %s826_s9 = scalar_lea.hbm %s1094_s0, 1024 }
   0x2   :  { %s20_s28 = sshll.u32 %s874_s27, 4  ;;  %p827_p0 = scmp.ne.s32.totalorder %s1094_s0, %s826_s9  ;;  %s21_s28 = int_to_ptr.vmem [resolvable:$true] %s20_s28 }
   0x3   :  { %p830_p1 = scmp.lt.u32.totalorder %s826_s9, %s1094_s0 }
   0x5   :  { %p832_p2 = pnand %p830_p1, %p827_p0 }
   0x7   :  { %835 = shalt.err (!%p832_p2)
}
   0x8   :  { %s836_s14 = scalar_lea.vmem %s21_s28, 1024  ;;  %p841_p4 = scmp.lt.s32.totalorder %s21_s28, %s21_s28 }
   0x9   :  { %p837_p3 = scmp.ne.s32.totalorder %s21_s28, %s836_s14  ;;  %p842_p5 = scmp.lt.s32.totalorder %s836_s14, %s836_s14 }
   0xb   :  { %p843_p6 = por %p842_p5, %p841_p4 }
   0xd   :  { %p844_p7 = pnand %p843_p6, %p837_p3 }
   0xf   :  { %847 = shalt.err (!%p844_p7)
}
  0x10   :  { %s875_s15 = smov 128   ;;  %s876_s16 = smov 8  }
  0x11   :  { %26 = dma.hbm_to_vmem [thread:$0]  %s1094_s0, 1024, %s21_s28, [#allocation3], %s875_s15, %s875_s15, %s876_s16  }
  0x12   :  { %870 = dma.done.wait [#allocation3], 1024  }
  0x13   :  { %871 = vsyncadd [#allocation3], 4294966272  ;;  %vm63_vm0 = vcmask 261120   ;;  %v52_v0 = vld [vmem:[%s1095_s1] sm:$0xff]  ;;  %v53_v1 = vld [vmem:[%s1095_s1 + $0x8] sm:$0xff]  ;;  %v877_v59 = vmov 0.0|0.0  }
  0x14   :  { %v54_v2 = vld [vmem:[%s1095_s1 + $0x10] sm:$0xff]  ;;  %v734_v3 = vpack.c.bf16 %v53_v1, %v52_v0  ;;  %v55_v4 = vld [vmem:[%s1095_s1 + $0x18] sm:$0xff]  ;;  %v950_v5 = vld [vmem:[#allocation2] sm:$0xff]  ;;  %742 = vmatprep.subr.bf16.mxu1 %v877_v59  ;;  %vm878_vm1 = vmmov 0   ;;  %v879_v62 = vmov 0.0   ;;  %vm467_vm2 = vcmask 1041409  }
  0x15   :  { %v738_v6 = vpack.c.bf16 %v55_v4, %v54_v2  ;;  %704 = vmatprep.mubr.msk.f32.mxu0 %vm63_vm0, %v950_v5  ;;  %v954_v7 = vld [vmem:[#allocation2 + $0x8] sm:$0xff]  ;;  %v956_v8 = vld [vmem:[#allocation2 + $0x10] sm:$0xff]  ;;  %v962_v9 = vld [vmem:[#allocation2 + $0x18] sm:$0xff]  ;;  %724 = vmatprep.mubr.msk.f32.mxu1 %vm878_vm1, %v879_v62  ;;  %vm469_vm3 = vcmask 1042434   ;;  %vm471_vm4 = vcmask 1043459   ;;  %vm473_vm5 = vcmask 1044484  }
  0x16   :  { %735 = vmatprep.subr.bf16.mxu0 %v734_v3  ;;  %v964_v10 = vld [vmem:[#allocation2 + $0x20] sm:$0xff]  ;;  %v970_v11 = vld [vmem:[#allocation2 + $0x28] sm:$0xff]  ;;  %v972_v12 = vld [vmem:[#allocation2 + $0x30] sm:$0xff]  ;;  %vm475_vm6 = vcmask 1045509   ;;  %vm477_vm7 = vcmask 1046534   ;;  %vm479_vm8 = vcmask 1047559  }
  0x17   :  { %737 = vmatpush3.bf16.msra.mxu0 %v734_v3  ;;  %v978_v13 = vld [vmem:[#allocation2 + $0x38] sm:$0xff]  ;;  %v662_v14 = vld [vmem:[%s1096_s2] ss:$0 sm:$0xff]  ;;  %v449_v57 = vld [vmem:[%s1098_s4 + $0x8] sm:$0xff]  ;;  %vm563_vm9 = vcmask 130048  }
  0x18   :  { %739 = vmatprep.subr.bf16.mxu0 %v738_v6  ;;  %v671_v27 = vld [vmem:[%s1097_s3] ss:$0 sm:$0xff]  ;;  %v450_v58 = vld [vmem:[%s1098_s4 + $0x10] sm:$0xff]  ;;  %v451_v61 = vld [vmem:[%s1098_s4 + $0x18] sm:$0xff] }
  0x19   :  { %v448_v56 = vld [vmem:[%s1098_s4] sm:$0xff]  ;;  %v746_v63 = vpack.c.bf16 %v451_v61, %v450_v58 }
  0x1a   :  { %v743_v60 = vpack.c.bf16 %v449_v57, %v448_v56 }
  0x1b   :  { %741 = vmatpush3.bf16.msra.mxu0 %v738_v6 }
  0x1c   :  { %744 = vmatpush3.bf16.msra.mxu1 %v743_v60 }
  0x1d   :  { %745 = vmatprep.subr.bf16.mxu1 %v877_v59 }
  0x1e   :  { %705 = vmatmul.mubr.msk.f32.vlgmr.msra.gmra.mrb[0].mxu0 %vm63_vm0, %v954_v7 }
  0x1f   :  { %707 = vmatprep.mubr.msk.f32.mxu0 %vm63_vm0, %v956_v8 }
  0x20   :  { %747 = vmatpush3.bf16.msra.mxu1 %v746_v63 }
  0x21   :  { %748 = vmatprep.subr.bf16.mxu1 %v877_v59 }
  0x22   :  { %708 = vmatmul.mubr.msk.f32.gmra.mrb[2].mxu0 %vm63_vm0, %v962_v9 }
  0x23   :  { %710 = vmatprep.mubr.msk.f32.mxu0 %vm63_vm0, %v964_v10 }
  0x26   :  { %711 = vmatmul.mubr.msk.f32.gmra.mrb[4].mxu0 %vm63_vm0, %v970_v11 }
  0x27   :  { %713 = vmatprep.mubr.msk.f32.mxu0 %vm63_vm0, %v972_v12 }
  0x2a   :  { %714 = vmatmul.mubr.msk.f32.gmra.mrb[6].mxu0 %vm63_vm0, %v978_v13 }
  0xf1   :  { %v706_v15 = vpop.f32.mrb[0].mxu0 }
  0xf2   :  { %v160_v16 = vadd.f32 %v706_v15, %v662_v14  ;;  %v154_v17 = vpop.f32.mrb[1].mxu0 }
  0xf3   :  { %v155_v18 = vadd.f32 %v662_v14, %v154_v17 }
  0xf4   :  { %758 = vtanh.f32 %v160_v16 }
  0xf5   :  { %760 = vtanh.f32 %v155_v18  ;;  %v709_v19 = vpop.f32.mrb[2].mxu0 }
  0xf6   :  { %v170_v20 = vadd.f32 %v709_v19, %v662_v14  ;;  %v164_v21 = vpop.f32.mrb[3].mxu0 }
  0xf7   :  { %v165_v22 = vadd.f32 %v662_v14, %v164_v21 }
  0xf8   :  { %762 = vtanh.f32 %v170_v20 }
  0xf9   :  { %764 = vtanh.f32 %v165_v22  ;;  %v712_v23 = vpop.f32.mrb[4].mxu0 }
  0xfa   :  { %v180_v24 = vadd.f32 %v712_v23, %v662_v14  ;;  %v174_v25 = vpop.f32.mrb[5].mxu0 }
  0xfb   :  { %v175_v26 = vadd.f32 %v662_v14, %v174_v25 }
  0xfc   :  { %766 = vtanh.f32 %v180_v24 }
  0xfd   :  { %768 = vtanh.f32 %v175_v26  ;;  %v715_v28 = vpop.f32.mrb[6].mxu0 }
  0xfe   :  { %v759_v29 = vpop.eup %758  ;;  %v190_v30 = vadd.f32 %v715_v28, %v662_v14  ;;  %v184_v31 = vpop.f32.mrb[7].mxu0 }
  0xff   :  { %v761_v32 = vpop.eup %760  ;;  %v185_v33 = vadd.f32 %v662_v14, %v184_v31  ;;  %v209_v34 = vmul.f32 %v759_v29, %v671_v27 }
 0x100   :  { %770 = vtanh.f32 %v190_v30  ;;  %v208_v36 = vmul.f32 %v761_v32, %v671_v27 }
 0x101   :  { %772 = vtanh.f32 %v185_v33  ;;  %v219_v35 = vsel %vm63_vm0, %v209_v34, 0.0 }
 0x102   :  { %v763_v37 = vpop.eup %762  ;;  %220 = vadd.xlane.f32.xlu0 %v219_v35  ;;  %v216_v41 = vsel %vm63_vm0, %v208_v36, 0.0 }
 0x103   :  { %v765_v38 = vpop.eup %764  ;;  %v211_v39 = vmul.f32 %v763_v37, %v671_v27 }
 0x104   :  { %v210_v42 = vmul.f32 %v765_v38, %v671_v27 }
 0x105   :  { %v225_v40 = vsel %vm63_vm0, %v211_v39, 0.0 }
 0x106   :  { %v767_v43 = vpop.eup %766  ;;  %226 = vadd.xlane.f32.xlu1 %v225_v40  ;;  %217 = vadd.xlane.f32.xlu0 %v216_v41  ;;  %v222_v46 = vsel %vm63_vm0, %v210_v42, 0.0 }
 0x107   :  { %v769_v44 = vpop.eup %768  ;;  %v213_v47 = vmul.f32 %v767_v43, %v671_v27 }
 0x108   :  { %v212_v45 = vmul.f32 %v769_v44, %v671_v27 }
 0x109   :  { %v231_v52 = vsel %vm63_vm0, %v213_v47, 0.0 }
 0x10a   :  { %v771_v48 = vpop.eup %770  ;;  %223 = vadd.xlane.f32.xlu1 %v222_v46  ;;  %v228_v49 = vsel %vm63_vm0, %v212_v45, 0.0 }
 0x10b   :  { %v773_v50 = vpop.eup %772  ;;  %229 = vadd.xlane.f32.xlu0 %v228_v49  ;;  %v215_v53 = vmul.f32 %v771_v48, %v671_v27 }
 0x10c   :  { %v214_v51 = vmul.f32 %v773_v50, %v671_v27 }
 0x10d   :  { %v237_v55 = vsel %vm63_vm0, %v215_v53, 0.0 }
 0x10e   :  { %232 = vadd.xlane.f32.xlu1 %v231_v52  ;;  %v234_v54 = vsel %vm63_vm0, %v214_v51, 0.0 }
 0x10f   :  { %235 = vadd.xlane.f32.xlu0 %v234_v54 }
 0x112   :  { %238 = vadd.xlane.f32.xlu1 %v237_v55 }
 0x18f   :  { %v221_v0 = vpop.xlane.xlu0 %220 }
 0x190   :  { %774 = vtanh.f32 %v221_v0 }
 0x193   :  { %v227_v1 = vpop.xlane.xlu1 %226  ;;  %v218_v2 = vpop.xlane.xlu0 %217 }
 0x194   :  { %776 = vtanh.f32 %v227_v1 }
 0x195   :  { %778 = vtanh.f32 %v218_v2 }
 0x197   :  { %v224_v3 = vpop.xlane.xlu1 %223 }
 0x198   :  { %780 = vtanh.f32 %v224_v3  ;;  %v230_v4 = vpop.xlane.xlu0 %229 }
 0x199   :  { %782 = vtanh.f32 %v230_v4 }
 0x19a   :  { %v775_v6 = vpop.eup %774 }
 0x19b   :  { %v254_v14 = vrot.slane %v775_v6, 4  ;;  %v233_v15 = vpop.xlane.xlu1 %232 }
 0x19c   :  { %784 = vtanh.f32 %v233_v15  ;;  %v236_v16 = vpop.xlane.xlu0 %235 }
 0x19d   :  { %v255_v17 = vmax.f32 %v775_v6, %v254_v14  ;;  %786 = vtanh.f32 %v236_v16 }
 0x19e   :  { %v777_v18 = vpop.eup %776 }
 0x19f   :  { %v779_v19 = vpop.eup %778  ;;  %v256_v20 = vrot.slane %v255_v17, 2  ;;  %v266_v21 = vrot.slane %v777_v18, 4  ;;  %v239_v22 = vpop.xlane.xlu1 %238 }
 0x1a0   :  { %v248_v23 = vrot.slane %v779_v19, 4  ;;  %788 = vtanh.f32 %v239_v22 }
 0x1a1   :  { %v257_v24 = vmax.f32 %v255_v17, %v256_v20  ;;  %v267_v25 = vmax.f32 %v777_v18, %v266_v21 }
 0x1a2   :  { %v781_v26 = vpop.eup %780  ;;  %v249_v27 = vmax.f32 %v779_v19, %v248_v23 }
 0x1a3   :  { %v783_v28 = vpop.eup %782  ;;  %v258_v29 = vrot.slane %v257_v24, 1  ;;  %v268_v30 = vrot.slane %v267_v25, 2  ;;  %v260_v31 = vrot.slane %v781_v26, 4 }
 0x1a4   :  { %v250_v32 = vrot.slane %v249_v27, 2  ;;  %v272_v33 = vrot.slane %v783_v28, 4 }
 0x1a5   :  { %v259_v34 = vmax.f32 %v257_v24, %v258_v29  ;;  %v269_v35 = vmax.f32 %v267_v25, %v268_v30  ;;  %v261_v36 = vmax.f32 %v781_v26, %v260_v31 }
 0x1a6   :  { %v785_v37 = vpop.eup %784  ;;  %v251_v38 = vmax.f32 %v249_v27, %v250_v32  ;;  %v273_v39 = vmax.f32 %v783_v28, %v272_v33 }
 0x1a7   :  { %v787_v40 = vpop.eup %786  ;;  %v297_v41 = vsub.f32 %v775_v6, %v259_v34  ;;  %v270_v42 = vrot.slane %v269_v35, 1  ;;  %v262_v43 = vrot.slane %v261_v36, 2  ;;  %v278_v44 = vrot.slane %v785_v37, 4 }
 0x1a8   :  { %v252_v45 = vrot.slane %v251_v38, 1  ;;  %v274_v46 = vrot.slane %v273_v39, 2  ;;  %v284_v47 = vrot.slane %v787_v40, 4 }
 0x1a9   :  { %v306_v48 = vmul.f32 1.442695, %v297_v41  ;;  %v271_v49 = vmax.f32 %v269_v35, %v270_v42  ;;  %v263_v50 = vmax.f32 %v261_v36, %v262_v43  ;;  %v279_v51 = vmax.f32 %v785_v37, %v278_v44 }
 0x1aa   :  { %v789_v52 = vpop.eup %788  ;;  %v253_v53 = vmax.f32 %v251_v38, %v252_v45  ;;  %v275_v54 = vmax.f32 %v273_v39, %v274_v46  ;;  %v285_v55 = vmax.f32 %v787_v40, %v284_v47 }
 0x1ab   :  { %790 = vpow2.f32 %v306_v48  ;;  %v299_v56 = vsub.f32 %v777_v18, %v271_v49  ;;  %v264_v57 = vrot.slane %v263_v50, 1  ;;  %v280_v58 = vrot.slane %v279_v51, 2 }
 0x1ac   :  { %v296_v59 = vsub.f32 %v779_v19, %v253_v53  ;;  %v276_v60 = vrot.slane %v275_v54, 1  ;;  %v286_v61 = vrot.slane %v285_v55, 2  ;;  %v290_v63 = vrot.slane %v789_v52, 4 }
 0x1ad   :  { %v310_v0 = vmul.f32 1.442695, %v299_v56  ;;  %v265_v1 = vmax.f32 %v263_v50, %v264_v57  ;;  %v281_v2 = vmax.f32 %v279_v51, %v280_v58 }
 0x1ae   :  { %v304_v3 = vmul.f32 1.442695, %v296_v59  ;;  %v277_v4 = vmax.f32 %v275_v54, %v276_v60  ;;  %v287_v6 = vmax.f32 %v285_v55, %v286_v61  ;;  %v291_v14 = vmax.f32 %v789_v52, %v290_v63 }
 0x1af   :  { %792 = vpow2.f32 %v310_v0  ;;  %v298_v15 = vsub.f32 %v781_v26, %v265_v1  ;;  %v282_v16 = vrot.slane %v281_v2, 1 }
 0x1b0   :  { %794 = vpow2.f32 %v304_v3  ;;  %v300_v17 = vsub.f32 %v783_v28, %v277_v4  ;;  %v288_v20 = vrot.slane %v287_v6, 1  ;;  %v292_v18 = vrot.slane %v291_v14, 2 }
 0x1b1   :  { %v308_v21 = vmul.f32 1.442695, %v298_v15  ;;  %v283_v22 = vmax.f32 %v281_v2, %v282_v16 }
 0x1b2   :  { %v312_v19 = vmul.f32 1.442695, %v300_v17  ;;  %v289_v23 = vmax.f32 %v287_v6, %v288_v20  ;;  %v293_v24 = vmax.f32 %v291_v14, %v292_v18 }
 0x1b3   :  { %796 = vpow2.f32 %v308_v21  ;;  %v301_v25 = vsub.f32 %v785_v37, %v283_v22 }
 0x1b4   :  { %798 = vpow2.f32 %v312_v19  ;;  %v302_v27 = vsub.f32 %v787_v40, %v289_v23  ;;  %v294_v29 = vrot.slane %v293_v24, 1 }
 0x1b5   :  { %v1010_v30 = vpop.eup %790  ;;  %v314_v31 = vmul.f32 1.442695, %v301_v25 }
 0x1b6   :  { %v316_v32 = vmul.f32 1.442695, %v302_v27  ;;  %v295_v26 = vmax.f32 %v293_v24, %v294_v29  ;;  %v326_v33 = vrot.slane %v1010_v30, 4 }
 0x1b7   :  { %800 = vpow2.f32 %v314_v31 }
 0x1b8   :  { %802 = vpow2.f32 %v316_v32  ;;  %v303_v28 = vsub.f32 %v789_v52, %v295_v26  ;;  %v327_v34 = vadd.f32 %v1010_v30, %v326_v33 }
 0x1b9   :  { %v1014_v35 = vpop.eup %792 }
 0x1ba   :  { %v1016_v36 = vpop.eup %794  ;;  %v318_v37 = vmul.f32 1.442695, %v303_v28  ;;  %v328_v38 = vrot.slane %v327_v34, 2  ;;  %v338_v39 = vrot.slane %v1014_v35, 4 }
 0x1bb   :  { %v320_v40 = vrot.slane %v1016_v36, 4 }
 0x1bc   :  { %804 = vpow2.f32 %v318_v37  ;;  %v329_v41 = vadd.f32 %v328_v38, %v327_v34  ;;  %v339_v42 = vadd.f32 %v1014_v35, %v338_v39 }
 0x1bd   :  { %v1021_v43 = vpop.eup %796  ;;  %v321_v44 = vadd.f32 %v1016_v36, %v320_v40 }
 0x1be   :  { %v1024_v45 = vpop.eup %798  ;;  %v330_v46 = vrot.slane %v329_v41, 1  ;;  %v332_v47 = vrot.slane %v1021_v43, 4  ;;  %v340_v48 = vrot.slane %v339_v42, 2 }
 0x1bf   :  { %v322_v49 = vrot.slane %v321_v44, 2  ;;  %v344_v50 = vrot.slane %v1024_v45, 4 }
 0x1c0   :  { %v331_v51 = vadd.f32 %v330_v46, %v329_v41  ;;  %v333_v52 = vadd.f32 %v1021_v43, %v332_v47  ;;  %v341_v53 = vadd.f32 %v340_v48, %v339_v42 }
 0x1c1   :  { %v1029_v54 = vpop.eup %800  ;;  %v323_v55 = vadd.f32 %v322_v49, %v321_v44  ;;  %v345_v56 = vadd.f32 %v1024_v45, %v344_v50 }
 0x1c2   :  { %v1032_v57 = vpop.eup %802  ;;  %v334_v58 = vrot.slane %v333_v52, 2  ;;  %v342_v59 = vrot.slane %v341_v53, 1  ;;  %v350_v60 = vrot.slane %v1029_v54, 4  ;;  %806 = vrcp.f32 %v331_v51 }
 0x1c3   :  { %v324_v61 = vrot.slane %v323_v55, 1  ;;  %v346_v63 = vrot.slane %v345_v56, 2  ;;  %v356_v0 = vrot.slane %v1032_v57, 4 }
 0x1c4   :  { %v335_v1 = vadd.f32 %v334_v58, %v333_v52  ;;  %v343_v2 = vadd.f32 %v342_v59, %v341_v53  ;;  %v351_v3 = vadd.f32 %v1029_v54, %v350_v60 }
 0x1c5   :  { %v325_v4 = vadd.f32 %v324_v61, %v323_v55  ;;  %v347_v6 = vadd.f32 %v346_v63, %v345_v56  ;;  %v357_v14 = vadd.f32 %v1032_v57, %v356_v0 }
 0x1c6   :  { %v1038_v15 = vpop.eup %804  ;;  %v336_v16 = vrot.slane %v335_v1, 1  ;;  %v352_v17 = vrot.slane %v351_v3, 2  ;;  %808 = vrcp.f32 %v343_v2 }
 0x1c7   :  { %v348_v20 = vrot.slane %v347_v6, 1  ;;  %v358_v18 = vrot.slane %v357_v14, 2  ;;  %v362_v21 = vrot.slane %v1038_v15, 4  ;;  %810 = vrcp.f32 %v325_v4 }
 0x1c8   :  { %v337_v22 = vadd.f32 %v336_v16, %v335_v1  ;;  %v353_v19 = vadd.f32 %v352_v17, %v351_v3 }
 0x1c9   :  { %v349_v23 = vadd.f32 %v348_v20, %v347_v6  ;;  %v359_v24 = vadd.f32 %v358_v18, %v357_v14  ;;  %v363_v25 = vadd.f32 %v1038_v15, %v362_v21 }
 0x1ca   :  { %v354_v27 = vrot.slane %v353_v19, 1  ;;  %812 = vrcp.f32 %v337_v22 }
 0x1cb   :  { %v360_v29 = vrot.slane %v359_v24, 1  ;;  %v364_v31 = vrot.slane %v363_v25, 2  ;;  %814 = vrcp.f32 %v349_v23 }
 0x1cc   :  { %v807_v32 = vpop.eup %806  ;;  %v355_v26 = vadd.f32 %v354_v27, %v353_v19 }
 0x1cd   :  { %v361_v33 = vadd.f32 %v360_v29, %v359_v24  ;;  %v365_v28 = vadd.f32 %v364_v31, %v363_v25  ;;  %v377_v34 = vmul.f32 %v807_v32, %v1010_v30 }
 0x1ce   :  { %816 = vrcp.f32 %v355_v26 }
 0x1cf   :  { %v366_v37 = vrot.slane %v365_v28, 1  ;;  %818 = vrcp.f32 %v361_v33  ;;  %v385_v38 = vmul.f32 %v377_v34, %v954_v7 }
 0x1d0   :  { %v809_v39 = vpop.eup %808 }
 0x1d1   :  { %v811_v40 = vpop.eup %810  ;;  %v367_v41 = vadd.f32 %v366_v37, %v365_v28  ;;  %v379_v42 = vmul.f32 %v809_v39, %v1014_v35  ;;  %v399_v44 = vsel %vm63_vm0, %v385_v38, 0.0 }
 0x1d2   :  { %v376_v46 = vmul.f32 %v811_v40, %v1016_v36  ;;  %v400_v47 = vrot.slane %v399_v44, 4 }
 0x1d3   :  { %820 = vrcp.f32 %v367_v41  ;;  %v387_v48 = vmul.f32 %v379_v42, %v962_v9 }
 0x1d4   :  { %v813_v49 = vpop.eup %812  ;;  %v384_v30 = vmul.f32 %v376_v46, %v950_v5  ;;  %v401_v50 = vadd.f32 %v400_v47, %v399_v44 }
 0x1d5   :  { %v815_v51 = vpop.eup %814  ;;  %v378_v7 = vmul.f32 %v813_v49, %v1021_v43  ;;  %v413_v52 = vsel %vm63_vm0, %v387_v48, 0.0 }
 0x1d6   :  { %v380_v53 = vmul.f32 %v815_v51, %v1024_v45  ;;  %v392_v35 = vsel %vm63_vm0, %v384_v30, 0.0  ;;  %v414_v55 = vrot.slane %v413_v52, 4  ;;  %v402_v58 = vrot.slane %v401_v50, 2 }
 0x1d7   :  { %v386_v36 = vmul.f32 %v378_v7, %v956_v8  ;;  %v393_v56 = vrot.slane %v392_v35, 4 }
 0x1d8   :  { %v817_v59 = vpop.eup %816  ;;  %v388_v9 = vmul.f32 %v380_v53, %v964_v10  ;;  %v415_v60 = vadd.f32 %v414_v55, %v413_v52  ;;  %v403_v8 = vadd.f32 %v402_v58, %v401_v50 }
 0x1d9   :  { %v819_v5 = vpop.eup %818  ;;  %v381_v61 = vmul.f32 %v817_v59, %v1029_v54  ;;  %v394_v63 = vadd.f32 %v393_v56, %v392_v35  ;;  %v406_v43 = vsel %vm63_vm0, %v386_v36, 0.0 }
 0x1da   :  { %v382_v0 = vmul.f32 %v819_v5, %v1032_v57  ;;  %v407_v45 = vrot.slane %v406_v43, 4  ;;  %v416_v1 = vrot.slane %v415_v60, 2  ;;  %v420_v4 = vsel %vm63_vm0, %v388_v9, 0.0  ;;  %v555_v5 = vld [vmem:[%s1100_s6 + $0x8] sm:$0xff] }
 0x1db   :  { %v389_v2 = vmul.f32 %v381_v61, %v970_v11  ;;  %v395_v3 = vrot.slane %v394_v63, 2  ;;  %v421_v54 = vrot.slane %v420_v4, 4  ;;  %v404_v19 = vrot.slane %v403_v8, 1 }
 0x1dc   :  { %v390_v6 = vmul.f32 %v382_v0, %v972_v12  ;;  %v408_v10 = vadd.f32 %v407_v45, %v406_v43  ;;  %v417_v14 = vadd.f32 %v416_v1, %v415_v60  ;;  %v554_v60 = vld [vmem:[%s1100_s6] sm:$0xff] }
 0x1dd   :  { %v821_v16 = vpop.eup %820  ;;  %v396_v17 = vadd.f32 %v395_v3, %v394_v63  ;;  %v427_v20 = vsel %vm63_vm0, %v389_v2, 0.0  ;;  %v422_v11 = vadd.f32 %v421_v54, %v420_v4  ;;  %v405_v28 = vadd.f32 %v404_v19, %v403_v8  ;;  %v672_v63 = vld [vmem:[%s1099_s5] ss:$0 sm:$0xff]  ;;  %s880_s5 = smov [#allocation5]  }
 0x1de   :  { %v383_v18 = vmul.f32 %v821_v16, %v1038_v15  ;;  %v409_v57 = vrot.slane %v408_v10, 2  ;;  %v428_v21 = vrot.slane %v427_v20, 4  ;;  %v434_v23 = vsel %vm63_vm0, %v390_v6, 0.0  ;;  %s653_s6 = sshll.u32 %s880_s5, 4  ;;  %s654_s6 = int_to_ptr.vmem [resolvable:$true] %s653_s6 }
 0x1df   :  { %v397_v22 = vrot.slane %v396_v17, 1  ;;  %v418_v12 = vrot.slane %v417_v14, 1  ;;  %v423_v31 = vrot.slane %v422_v11, 2  ;;  %v435_v32 = vrot.slane %v434_v23, 4  ;;  %s848_s20 = scalar_lea.vmem %s654_s6, 128  ;;  %p853_p9 = scmp.lt.s32.totalorder %s654_s6, %s654_s6 }
 0x1e0   :  { %v391_v24 = vmul.f32 %v383_v18, %v978_v13  ;;  %v410_v25 = vadd.f32 %v409_v57, %v408_v10  ;;  %v429_v27 = vadd.f32 %v428_v21, %v427_v20  ;;  %v749_v61 = vpack.c.bf16 %v555_v5, %v554_v60  ;;  %p849_p8 = scmp.ne.s32.totalorder %s654_s6, %s848_s20  ;;  %p854_p10 = scmp.lt.s32.totalorder %s848_s20, %s848_s20 }
 0x1e1   :  { %v398_v29 = vadd.f32 %v397_v22, %v396_v17  ;;  %v424_v34 = vadd.f32 %v423_v31, %v422_v11  ;;  %v436_v37 = vadd.f32 %v435_v32, %v434_v23  ;;  %v419_v40 = vadd.f32 %v418_v12, %v417_v14 }
 0x1e2   :  { %v411_v26 = vrot.slane %v410_v25, 1  ;;  %v430_v33 = vrot.slane %v429_v27, 2  ;;  %v441_v15 = vsel %vm63_vm0, %v391_v24, 0.0  ;;  %p855_p11 = por %p854_p10, %p853_p9 }
 0x1e3   :  { %v442_v38 = vrot.slane %v441_v15, 4  ;;  %v425_v13 = vrot.slane %v424_v34, 1  ;;  %v437_v42 = vrot.slane %v436_v37, 2  ;;  %v468_v46 = vsel %vm467_vm2, %v405_v28, %v398_v29 }
 0x1e4   :  { %v412_v39 = vadd.f32 %v411_v26, %v410_v25  ;;  %v431_v41 = vadd.f32 %v430_v33, %v429_v27  ;;  %p856_p12 = pnand %p855_p11, %p849_p8 }
 0x1e5   :  { %v443_v44 = vadd.f32 %v442_v38, %v441_v15  ;;  %v426_v49 = vadd.f32 %v425_v13, %v424_v34  ;;  %v438_v30 = vadd.f32 %v437_v42, %v436_v37 }
 0x1e6   :  { %v432_v47 = vrot.slane %v431_v41, 1  ;;  %v470_v48 = vsel %vm469_vm3, %v412_v39, %v468_v46 }
 0x1e7   :  { %v444_v50 = vrot.slane %v443_v44, 2  ;;  %v472_v51 = vsel %vm471_vm4, %v419_v40, %v470_v48  ;;  %v439_v52 = vrot.slane %v438_v30, 1 }
 0x1e8   :  { %v433_v7 = vadd.f32 %v432_v47, %v431_v41  ;;  %v474_v35 = vsel %vm473_vm5, %v426_v49, %v472_v51 }
 0x1e9   :  { %v445_v53 = vadd.f32 %v444_v50, %v443_v44  ;;  %v440_v55 = vadd.f32 %v439_v52, %v438_v30 }
 0x1ea   :  { %v476_v56 = vsel %vm475_vm6, %v433_v7, %v474_v35 }
 0x1eb   :  { %v446_v36 = vrot.slane %v445_v53, 1  ;;  %v478_v59 = vsel %vm477_vm7, %v440_v55, %v476_v56 }
 0x1ed   :  { %v447_v58 = vadd.f32 %v446_v36, %v445_v53 }
 0x1ef   :  { %v480_v9 = vsel %vm479_vm8, %v447_v58, %v478_v59 }
 0x1f0   :  { %725 = vmatmul.mubr.msk.f32.vlgmr.msra.gmra.mrb[0].mxu1 %vm63_vm0, %v480_v9 }
 0x1f1   :  { %731 = vmatprep.mubr.msk.f32.mxu1 %vm878_vm1, %v879_v62  ;;  %750 = vmatpush3.bf16.msra.mxu1 %v749_v61  ;;  %v674_v62 = vld [vmem:[%s1101_s7] ss:$0 sm:$0xff] }
 0x2c3   :  { %v549_v43 = vpop.f32.mrb[0].mxu1 }
 0x2c4   :  { %v550_v0 = vadd.f32 %v672_v63, %v549_v43  ;;  %v726_v45 = vpop.f32.mrb[1].mxu1 }
 0x2c6   :  { %v553_v1 = vmax.f32 %v550_v0, 0.0 }
 0x2c8   :  { %732 = vmatmul.mubr.msk.f32.vlgmr.msra.gmra.mrb[2].mxu1 %vm563_vm9, %v553_v1 }
 0x39b   :  { %v633_v2 = vpop.f32.mrb[2].mxu1 }
 0x39c   :  { %v634_v3 = vadd.f32 %v674_v62, %v633_v2  ;;  %v733_v8 = vpop.f32.mrb[3].mxu1 }
 0x39e   :  { %637 = vmax.xlane.f32.xlu0 %v634_v3 }
 0x42b   :  { %v638_v4 = vpop.xlane.xlu0 %637 }
 0x42c   :  { %v639_v6 = vsub.f32 %v634_v3, %v638_v4 }
 0x42e   :  { %v640_v10 = vmul.f32 1.442695, %v639_v6 }
 0x430   :  { %822 = vpow2.f32 %v640_v10 }
 0x43a   :  { %v823_v14 = vpop.eup %822 }
 0x43b   :  { %642 = vadd.xlane.f32.xlu1 %v823_v14 }
 0x4c8   :  { %v643_v16 = vpop.xlane.xlu1 %642 }
 0x4c9   :  { %824 = vrcp.f32 %v643_v16 }
 0x4d3   :  { %v825_v17 = vpop.eup %824 }
 0x4d4   :  { %v645_v54 = vmul.f32 %v825_v17, %v823_v14 }
 0x4d6   :  { %646 = vst [vmem:[#allocation5] sm:$0xff] %v645_v54 }
 0x4d7   :  { %859 = shalt.err (!%p856_p12)
}
 0x4d8   :  { %s860_s22 = scalar_lea.hbm %s1102_s8, 128 }
 0x4d9   :  { %p861_p13 = scmp.ne.s32.totalorder %s1102_s8, %s860_s22  ;;  %p864_p0 = scmp.lt.u32.totalorder %s860_s22, %s1102_s8 }
 0x4db   :  { %p866_p1 = pnand %p864_p0, %p861_p13 }
 0x4dd   :  { %869 = shalt.err (!%p866_p1)
}
 0x4de   :  { %656 = dma.vmem_to_hbm [thread:$0]  %s654_s6, 128, %s1102_s8, [#allocation4]  }
 0x4df   :  { %872 = dma.done.wait [#allocation4], 128  }
 0x4e0   :  { %873 = vsyncadd [#allocation4], 4294967168 }
 0x4e1   :  { %660 = vsyncpa [#allocation3], 1 }
 0x4e2   :  { %661 = vsyncpa [#allocation4], 1 }

</bundles_post_ra>
